<compile_context>
chip_gen: v5e
topology: v5e:2x2
jax: 0.10.0
libtpu: 0.0.40
codegen_flags: <defaults>
</compile_context>

<pallas_src>
import functools

import jax
import jax.numpy as jnp
from jax.experimental import pallas as pl
from jax.experimental.pallas import tpu as pltpu

LANE = 128
SUBLANE = 8


def _round_up(x, m):
    return (x + m - 1) // m * m


def _policy_kernel(s_pad, width, flag_ref, s_ref, w_ref, b_ref, eps_ref, a_ref):
    """One batch tile: loc = MLP(states); a = loc + action_std * N(0,1).

    flag_ref : SMEM int32 (1,)  -- 1 iff noise should be added (action_std != 0)
    s_ref    : (TB, S_pad) f32 states tile (cast to bf16 in-kernel)
    w_ref    : (S_pad + 2*W, W) bf16 packed [w1; w2; w3] (zero-padded, resident)
    b_ref    : (3, W) f32 packed [b1; b2; b3] (zero-padded, resident)
    eps_ref  : (TB, A) f32 pre-scaled noise (action_std * N(0,1); zeros if std==0)
    a_ref    : (TB, A) f32 output (only the real action columns are written)
    """
    a_cols = a_ref.shape[1]

    # Static row-slices of the packed weight slab (offsets are 16-aligned).
    w1 = w_ref[0:s_pad, :]                           # (S_pad, W)
    w2 = w_ref[s_pad:s_pad + width, :]               # (W, W)
    w3 = w_ref[s_pad + width:s_pad + 2 * width, :]   # (W, W)

    # bf16 MXU matmuls with f32 accumulation; tanh + bias adds in f32.
    x = s_ref[...].astype(jnp.bfloat16)
    h1 = jnp.tanh(
        jnp.dot(x, w1, preferred_element_type=jnp.float32) + b_ref[0:1, :])
    h2 = jnp.tanh(
        jnp.dot(h1.astype(jnp.bfloat16), w2, preferred_element_type=jnp.float32)
        + b_ref[1:2, :])
    loc = (jnp.dot(h2.astype(jnp.bfloat16), w3, preferred_element_type=jnp.float32)
           + b_ref[2:3, :])
    loc_a = loc[:, :a_cols]                          # narrow: real action columns

    # Mean is always written; the noise add only runs when std != 0.
    a_ref[...] = loc_a

    @pl.when(flag_ref[0] != 0)
    def _():
        a_ref[...] = loc_a + eps_ref[...]


def pack_params(params):
    """Pack w1/w2/w3 into one bf16 slab and b1/b2/b3 into one f32 slab.

    Matmul widths are padded to the lane width (128) with zeros so padded
    hidden columns stay exactly zero through the network.  Row offsets in the
    bf16 slab are kept 16-aligned (bf16 sublane packing).
    """
    w1, b1 = params["w1"], params["b1"]
    w2, b2 = params["w2"], params["b2"]
    w3, b3 = params["w3"], params["b3"]
    S, H1 = w1.shape
    H1b, H2 = w2.shape
    H2b, A = w3.shape
    assert H1 == H1b and H2 == H2b

    S_pad = _round_up(S, 16)
    W = max(_round_up(H1, LANE), _round_up(H2, LANE), _round_up(A, LANE))

    def pad2(m, rows, cols):
        out = jnp.zeros((rows, cols), jnp.float32)
        return out.at[:m.shape[0], :m.shape[1]].set(m)

    w_packed = jnp.concatenate(
        [pad2(w1, S_pad, W), pad2(w2, W, W), pad2(w3, W, W)],
        axis=0).astype(jnp.bfloat16)                     # (S_pad + 2W, W) bf16

    def pad1(v, n):
        return jnp.zeros((n,), jnp.float32).at[:v.shape[0]].set(v.reshape(-1))

    b_packed = jnp.stack([pad1(b1, W), pad1(b2, W), pad1(b3, W)], axis=0)  # (3, W)

    dims = dict(S=S, S_pad=S_pad, A=A, W=W)
    return w_packed, b_packed, dims


def policy_forward(states, packed, action_std, noise_key, *, tile_b=None):
    """Policy.forward (action_std path) via a single batched Pallas kernel.

    states : [B, S] or [S] float32
    packed : output of pack_params(params)
    """
    if action_std is None:
        # TODO(synk): corresponds to agent.sample_action(s, True); not modeled.
        raise NotImplementedError("action_std=None path requires agent internals")

    w_packed, b_packed, dims = packed
    was_1d = states.ndim == 1
    if was_1d:
        states = states[None, :]
    states = states.astype(jnp.float32)

    B, S = states.shape
    assert S == dims["S"]
    S_pad, W, A = dims["S_pad"], dims["W"], dims["A"]

    # Few, large batch tiles: default is ONE grid step (per-step overhead
    # ~0.35us dominates at these sizes; VMEM is never the limit here).
    # On v7x pass tile_b = ceil(B/2) so each TensorCore gets a tile.
    if tile_b is None:
        tile_b = _round_up(B, SUBLANE)
    else:
        tile_b = _round_up(min(tile_b, _round_up(B, SUBLANE)), SUBLANE)
    B_pad = _round_up(B, tile_b)
    n_tiles = B_pad // tile_b

    # Single cheap pad only when needed; bf16 cast happens inside the kernel.
    if B_pad != B or S_pad != S:
        s_in = jnp.pad(states, ((0, B_pad - B), (0, S_pad - S)))
    else:
        s_in = states

    # Pre-scaled Gaussian noise: generated (and read) only when std != 0.
    add_noise = float(action_std) != 0.0
    if add_noise:
        eps = float(action_std) * jax.random.normal(noise_key, (B, A), jnp.float32)
        if B_pad != B:
            eps = jnp.pad(eps, ((0, B_pad - B), (0, 0)))
    else:
        eps = jnp.zeros((B_pad, A), jnp.float32)
    flag = jnp.asarray([1 if add_noise else 0], jnp.int32)   # SMEM scalar

    kernel = functools.partial(_policy_kernel, S_pad, W)

    out = pl.pallas_call(
        kernel,
        out_shape=jax.ShapeDtypeStruct((B_pad, A), jnp.float32),
        grid_spec=pltpu.PrefetchScalarGridSpec(
            num_scalar_prefetch=0,
            grid=(n_tiles,),
            in_specs=[
                pl.BlockSpec(memory_space=pltpu.MemorySpace.SMEM),    # noise flag
                pl.BlockSpec((tile_b, S_pad), lambda i: (i, 0)),      # states tile (f32)
                pl.BlockSpec((S_pad + 2 * W, W), lambda i: (0, 0)),   # packed weights (resident)
                pl.BlockSpec((3, W), lambda i: (0, 0)),               # packed biases  (resident)
                pl.BlockSpec((tile_b, A), lambda i: (i, 0)),          # pre-scaled noise
            ],
            out_specs=pl.BlockSpec((tile_b, A), lambda i: (i, 0)),    # narrow output
        ),
        compiler_params=pltpu.CompilerParams(
            dimension_semantics=("parallel",)),
    )(flag, s_in, w_packed, b_packed, eps)

    a = out[:B] if B_pad != B else out
    if was_1d:
        a = a[0]
    return a


def init_params(key, state_size, hidden1, hidden2, action_size):
    """Deterministic synthetic 'agent' policy-network parameters."""
    k1, k2, k3, k4, k5, k6 = jax.random.split(key, 6)
    scale = 0.1
    return {
        "w1": scale * jax.random.normal(k1, (state_size, hidden1), jnp.float32),
        "b1": scale * jax.random.normal(k4, (hidden1,), jnp.float32),
        "w2": scale * jax.random.normal(k2, (hidden1, hidden2), jnp.float32),
        "b2": scale * jax.random.normal(k5, (hidden2,), jnp.float32),
        "w3": scale * jax.random.normal(k3, (hidden2, action_size), jnp.float32),
        "b3": scale * jax.random.normal(k6, (action_size,), jnp.float32),
    }


if __name__ == "__main__":
    key = jax.random.PRNGKey(0)
    k_param, k_state, k_noise = jax.random.split(key, 3)

    BATCH = 64
    STATE_SIZE = 32
    HIDDEN = 128          # lane-aligned hidden widths
    ACTION_SIZE = 8
    ACTION_STD = 0.2

    params = init_params(k_param, STATE_SIZE, HIDDEN, HIDDEN, ACTION_SIZE)
    packed = pack_params(params)
    states = jax.random.normal(k_state, (BATCH, STATE_SIZE), jnp.float32)

    # Same compiled kernel for sampled and mean calls (std only changes data).
    a = policy_forward(states, packed, ACTION_STD, k_noise)      # sampled actions
    loc = policy_forward(states, packed, 0.0, k_noise)           # std=0 -> pure mean
    jax.block_until_ready((a, loc))
    assert a.shape == (BATCH, ACTION_SIZE) and loc.shape == (BATCH, ACTION_SIZE)

    # Mean reference: f32 math with bf16-rounded matmul inputs (emulates the
    # bf16-in / f32-accumulate MXU path).
    bf = lambda x: x.astype(jnp.bfloat16).astype(jnp.float32)
    h1 = jnp.tanh(bf(states) @ bf(params["w1"]) + params["b1"])
    h2 = jnp.tanh(bf(h1) @ bf(params["w2"]) + params["b2"])
    loc_ref = bf(h2) @ bf(params["w3"]) + params["b3"]
    assert jnp.allclose(loc, loc_ref, atol=2e-2, rtol=2e-2), "loc mismatch vs reference"

    # Sampled actions must equal loc + std * z for the exact host-drawn noise.
    z = jax.random.normal(k_noise, (BATCH, ACTION_SIZE), jnp.float32)
    assert jnp.allclose(a, loc + ACTION_STD * z, atol=1e-5), "sample != loc + std*noise"

    # Tiling invariance: smaller batch tiles give the same result.
    a_tiled = policy_forward(states, packed, ACTION_STD, k_noise, tile_b=32)
    jax.block_until_ready(a_tiled)
    assert jnp.allclose(a, a_tiled, atol=1e-4), "result depends on tile_b"

    # 1-D state path (mirrors the `if n == 1: a = a[0]` branch).
    a1 = policy_forward(states[0], packed, ACTION_STD, k_noise)
    jax.block_until_ready(a1)
    assert a1.shape == (ACTION_SIZE,)

    print("KERNEL_OK")
</pallas_src>

<mosaic_0001>
module attributes {stable_mosaic.version = 11 : i64} {
  func.func @_policy_kernel(%arg0: i32, %arg1: memref<1xi32, #tpu.memory_space<smem>>, %arg2: memref<64x32xf32, #tpu.memory_space<vmem>>, %arg3: memref<288x128xbf16, #tpu.memory_space<vmem>>, %arg4: memref<3x128xf32, #tpu.memory_space<vmem>>, %arg5: memref<64x8xf32, #tpu.memory_space<vmem>>, %arg6: memref<64x8xf32, #tpu.memory_space<vmem>>) attributes {dimension_semantics = [#tpu.dimension_semantics<parallel>], iteration_bounds = array<i64: 1>, scalar_prefetch = 0 : i64, scratch_operands = 0 : i64, tpu.core_type = #tpu.core_type<tc>, window_params = [{transform_indices = @transform_0, window_bounds = array<i64: 1>}, {transform_indices = @transform_1, window_bounds = array<i64: 64, 32>}, {pipeline_mode = #tpu.pipeline_mode<synchronous>, transform_indices = @transform_2, window_bounds = array<i64: 288, 128>}, {pipeline_mode = #tpu.pipeline_mode<synchronous>, transform_indices = @transform_3, window_bounds = array<i64: 3, 128>}, {transform_indices = @transform_4, window_bounds = array<i64: 64, 8>}, {transform_indices = @transform_5, window_bounds = array<i64: 64, 8>}]} {
    %c0 = arith.constant 0 : index
    %c0_0 = arith.constant 0 : index
    %0 = vector.load %arg3[%c0, %c0_0] : memref<288x128xbf16, #tpu.memory_space<vmem>>, vector<32x128xbf16>
    %c32 = arith.constant 32 : index
    %c0_1 = arith.constant 0 : index
    %1 = vector.load %arg3[%c32, %c0_1] : memref<288x128xbf16, #tpu.memory_space<vmem>>, vector<128x128xbf16>
    %c160 = arith.constant 160 : index
    %c0_2 = arith.constant 0 : index
    %2 = vector.load %arg3[%c160, %c0_2] : memref<288x128xbf16, #tpu.memory_space<vmem>>, vector<128x128xbf16>
    %c0_3 = arith.constant 0 : index
    %c0_4 = arith.constant 0 : index
    %3 = vector.load %arg2[%c0_3, %c0_4] : memref<64x32xf32, #tpu.memory_space<vmem>>, vector<64x32xf32>
    %4 = arith.truncf %3 : vector<64x32xf32> to vector<64x32xbf16>
    %cst = arith.constant dense<0.000000e+00> : vector<64x128xf32>
    %5 = tpu.matmul %4, %0, %cst {dimension_numbers = #tpu.dot_dimension_numbers<[1], [0], [0], [1], [0, 0, 1, 1], [], []>} : vector<64x32xbf16>, vector<32x128xbf16>, vector<64x128xf32> -> vector<64x128xf32>
    %c0_5 = arith.constant 0 : index
    %c0_6 = arith.constant 0 : index
    %6 = vector.load %arg4[%c0_5, %c0_6] : memref<3x128xf32, #tpu.memory_space<vmem>>, vector<1x128xf32>
    %7 = vector.broadcast %6 : vector<1x128xf32> to vector<64x128xf32>
    %8 = arith.addf %5, %7 : vector<64x128xf32>
    %9 = math.tanh %8 : vector<64x128xf32>
    %10 = arith.truncf %9 : vector<64x128xf32> to vector<64x128xbf16>
    %cst_7 = arith.constant dense<0.000000e+00> : vector<64x128xf32>
    %11 = tpu.matmul %10, %1, %cst_7 {dimension_numbers = #tpu.dot_dimension_numbers<[1], [0], [0], [1], [0, 0, 1, 1], [], []>} : vector<64x128xbf16>, vector<128x128xbf16>, vector<64x128xf32> -> vector<64x128xf32>
    %c1 = arith.constant 1 : index
    %c0_8 = arith.constant 0 : index
    %12 = vector.load %arg4[%c1, %c0_8] : memref<3x128xf32, #tpu.memory_space<vmem>>, vector<1x128xf32>
    %13 = vector.broadcast %12 : vector<1x128xf32> to vector<64x128xf32>
    %14 = arith.addf %11, %13 : vector<64x128xf32>
    %15 = math.tanh %14 : vector<64x128xf32>
    %16 = arith.truncf %15 : vector<64x128xf32> to vector<64x128xbf16>
    %cst_9 = arith.constant dense<0.000000e+00> : vector<64x128xf32>
    %17 = tpu.matmul %16, %2, %cst_9 {dimension_numbers = #tpu.dot_dimension_numbers<[1], [0], [0], [1], [0, 0, 1, 1], [], []>} : vector<64x128xbf16>, vector<128x128xbf16>, vector<64x128xf32> -> vector<64x128xf32>
    %c2 = arith.constant 2 : index
    %c0_10 = arith.constant 0 : index
    %18 = vector.load %arg4[%c2, %c0_10] : memref<3x128xf32, #tpu.memory_space<vmem>>, vector<1x128xf32>
    %19 = vector.broadcast %18 : vector<1x128xf32> to vector<64x128xf32>
    %20 = arith.addf %17, %19 : vector<64x128xf32>
    %21 = vector.extract_strided_slice %20 {offsets = [0, 0], sizes = [64, 8], strides = [1, 1]} : vector<64x128xf32> to vector<64x8xf32>
    %c0_11 = arith.constant 0 : index
    %c0_12 = arith.constant 0 : index
    %22 = vector.load %arg6[%c0_11, %c0_12] : memref<64x8xf32, #tpu.memory_space<vmem>>, vector<64x8xf32>
    tpu.vector_store %arg6[%c0_11, %c0_12], %21 {strides = array<i32>} : memref<64x8xf32, #tpu.memory_space<vmem>>, vector<64x8xf32>,
    %c0_13 = arith.constant 0 : index
    %23 = memref.load %arg1[%c0_13] : memref<1xi32, #tpu.memory_space<smem>>
    %c0_i32 = arith.constant 0 : i32
    %24 = arith.cmpi ne, %23, %c0_i32 : i32
    %25 = arith.extui %24 : i1 to i32
    %c0_i32_14 = arith.constant 0 : i32
    %26 = arith.cmpi ne, %25, %c0_i32_14 : i32
    scf.if %26 {
      %c0_15 = arith.constant 0 : index
      %c0_16 = arith.constant 0 : index
      %27 = vector.load %arg5[%c0_15, %c0_16] : memref<64x8xf32, #tpu.memory_space<vmem>>, vector<64x8xf32>
      %28 = arith.addf %21, %27 : vector<64x8xf32>
      %c0_17 = arith.constant 0 : index
      %c0_18 = arith.constant 0 : index
      %29 = vector.load %arg6[%c0_17, %c0_18] : memref<64x8xf32, #tpu.memory_space<vmem>>, vector<64x8xf32>
      tpu.vector_store %arg6[%c0_17, %c0_18], %28 {strides = array<i32>} : memref<64x8xf32, #tpu.memory_space<vmem>>, vector<64x8xf32>,
    } else {
    }
    return
  }
  func.func @transform_0(%arg0: i32) -> i32 {
    %c0_i32 = arith.constant 0 : i32
    %c0_i32_0 = arith.constant 0 : i32
    return %c0_i32 : i32
  }
  func.func @transform_1(%arg0: i32) -> (i32, i32) {
    %c0_i32 = arith.constant 0 : i32
    %c0_i32_0 = arith.constant 0 : i32
    return %arg0, %c0_i32 : i32, i32
  }
  func.func @transform_2(%arg0: i32) -> (i32, i32) {
    %c0_i32 = arith.constant 0 : i32
    %c0_i32_0 = arith.constant 0 : i32
    %c0_i32_1 = arith.constant 0 : i32
    return %c0_i32, %c0_i32_0 : i32, i32
  }
  func.func @transform_3(%arg0: i32) -> (i32, i32) {
    %c0_i32 = arith.constant 0 : i32
    %c0_i32_0 = arith.constant 0 : i32
    %c0_i32_1 = arith.constant 0 : i32
    return %c0_i32, %c0_i32_0 : i32, i32
  }
  func.func @transform_4(%arg0: i32) -> (i32, i32) {
    %c0_i32 = arith.constant 0 : i32
    %c0_i32_0 = arith.constant 0 : i32
    return %arg0, %c0_i32 : i32, i32
  }
  func.func @transform_5(%arg0: i32) -> (i32, i32) {
    %c0_i32 = arith.constant 0 : i32
    %c0_i32_0 = arith.constant 0 : i32
    return %arg0, %c0_i32 : i32, i32
  }
}

</mosaic_0001>

<bundles_post_ra>
// kernel: tpu_custom_call.1
= control target key start
LH: loop header
LB: loop body
LE: loop exit
PB: predicated region body
PF: predicated region fallthrough
CT: control target
= control target key end

     0   :  { %vm84_vm0 = vcmask 261120   ;;  %vm308_vm1 = vcmask 64512   ;;  %s708_s0 = inlined_call_operand.<no memory space> [shape: s32[1], index: 0, kind: input, shape index: {}]   ;;  %s709_s2 = inlined_call_operand.vmem [shape: bf16[288,128], index: 2, kind: input, shape index: {}]   ;;  %s710_s4 = inlined_call_operand.vmem [shape: f32[64,8], index: 4, kind: input, shape index: {}]   ;;  %s711_s1 = inlined_call_operand.vmem [shape: f32[64,32], index: 1, kind: input, shape index: {}]   ;;  %s712_s3 = inlined_call_operand.vmem [shape: f32[3,128], index: 3, kind: input, shape index: {}]   ;;  %s713_s5 = inlined_call_operand.vmem [shape: f32[64,8], index: 5, kind: output, shape index: {}]  }
   0x1   :  { %v428_v0 = vld [vmem:[%s709_s2 + $0x8] sm:$0xff]  ;;  %v427_v1 = vld [vmem:[%s709_s2] sm:$0xff]  ;;  %v60_v5 = vld [vmem:[%s711_s1 + $0x10] sm:$0xff]  ;;  %p426_p0 = scmp.eq.s32.totalorder %s708_s0, 0 }
   0x2   :  { %103 = vmatpush.bf16.msra.mxu0 %v428_v0  ;;  %v58_v2 = vld [vmem:[%s711_s1] sm:$0xff]  ;;  %v59_v3 = vld [vmem:[%s711_s1 + $0x8] sm:$0xff]  ;;  %v61_v6 = vld [vmem:[%s711_s1 + $0x18] sm:$0xff] }
   0x3   :  { %v66_v4 = vpack.c.bf16 %v59_v3, %v58_v2  ;;  %v67_v7 = vpack.c.bf16 %v61_v6, %v60_v5  ;;  %v436_v8 = vld [vmem:[%s709_s2 + $0x48] sm:$0xff]  ;;  %v435_v9 = vld [vmem:[%s709_s2 + $0x40] sm:$0xff]  ;;  %v434_v10 = vld [vmem:[%s709_s2 + $0x38] sm:$0xff] }
   0x4   :  { %188 = vmatpush.bf16.msra.mxu1 %v436_v8  ;;  %445 = vmatpush.bf16.msra.mxu3 %v436_v8  ;;  %v62_v11 = vld [vmem:[%s711_s1 + $0x20] sm:$0xff]  ;;  %v63_v12 = vld [vmem:[%s711_s1 + $0x28] sm:$0xff]  ;;  %v64_v14 = vld [vmem:[%s711_s1 + $0x30] sm:$0xff] }
   0x5   :  { %v68_v13 = vpack.c.bf16 %v63_v12, %v62_v11  ;;  %v65_v15 = vld [vmem:[%s711_s1 + $0x38] sm:$0xff]  ;;  %v433_v17 = vld [vmem:[%s709_s2 + $0x30] sm:$0xff]  ;;  %v432_v18 = vld [vmem:[%s709_s2 + $0x28] sm:$0xff] }
   0x6   :  { %104 = vmatpush.bf16.msra.mxu0 %v427_v1  ;;  %v69_v16 = vpack.c.bf16 %v65_v15, %v64_v14  ;;  %v431_v19 = vld [vmem:[%s709_s2 + $0x20] sm:$0xff]  ;;  %v430_v20 = vld [vmem:[%s709_s2 + $0x18] sm:$0xff]  ;;  %v429_v21 = vld [vmem:[%s709_s2 + $0x10] sm:$0xff] }
   0x7   :  { %v461_v23 = vld [vmem:[%s712_s3] ss:$0 sm:$0xff]  ;;  %v444_v38 = vld [vmem:[%s709_s2 + $0x88] sm:$0xff]  ;;  %v442_v43 = vld [vmem:[%s709_s2 + $0x78] sm:$0xff] }
   0x8   :  { %189 = vmatpush.bf16.msra.mxu1 %v435_v9  ;;  %446 = vmatpush.bf16.msra.mxu3 %v435_v9  ;;  %v443_v40 = vld [vmem:[%s709_s2 + $0x80] sm:$0xff]  ;;  %v441_v54 = vld [vmem:[%s709_s2 + $0x70] sm:$0xff]  ;;  %v440_v55 = vld [vmem:[%s709_s2 + $0x68] sm:$0xff] }
   0x9   :  { %358 = vmatmul.msk.bf16.vlgmr.msra.gmra.mxu0 %vm84_vm0, %v66_v4  ;;  %453 = vmatpush.bf16.msra.mxu2 %v444_v38  ;;  %v439_v56 = vld [vmem:[%s709_s2 + $0x60] sm:$0xff]  ;;  %v438_v57 = vld [vmem:[%s709_s2 + $0x58] sm:$0xff]  ;;  %v437_v58 = vld [vmem:[%s709_s2 + $0x50] sm:$0xff] }
   0xa   :  { %v462_v60 = vld [vmem:[%s712_s3 + $0x1] ss:$0 sm:$0xff] }
   0xc   :  { %190 = vmatpush.bf16.msra.mxu1 %v434_v10  ;;  %447 = vmatpush.bf16.msra.mxu3 %v434_v10 }
   0xd   :  { %454 = vmatpush.bf16.msra.mxu2 %v443_v40 }
  0x10   :  { %191 = vmatpush.bf16.msra.mxu1 %v433_v17  ;;  %448 = vmatpush.bf16.msra.mxu3 %v433_v17 }
  0x11   :  { %455 = vmatpush.bf16.msra.mxu2 %v442_v43 }
  0x14   :  { %192 = vmatpush.bf16.msra.mxu1 %v432_v18  ;;  %449 = vmatpush.bf16.msra.mxu3 %v432_v18 }
  0x15   :  { %456 = vmatpush.bf16.msra.mxu2 %v441_v54 }
  0x18   :  { %193 = vmatpush.bf16.msra.mxu1 %v431_v19  ;;  %450 = vmatpush.bf16.msra.mxu3 %v431_v19 }
  0x19   :  { %359 = vmatmul.msk.bf16.gmra.mxu0 %vm84_vm0, %v67_v7  ;;  %457 = vmatpush.bf16.msra.mxu2 %v440_v55 }
  0x1c   :  { %194 = vmatpush.bf16.msra.mxu1 %v430_v20  ;;  %451 = vmatpush.bf16.msra.mxu3 %v430_v20 }
  0x1d   :  { %458 = vmatpush.bf16.msra.mxu2 %v439_v56 }
  0x20   :  { %195 = vmatpush.bf16.msra.mxu1 %v429_v21  ;;  %452 = vmatpush.bf16.msra.mxu3 %v429_v21 }
  0x21   :  { %459 = vmatpush.bf16.msra.mxu2 %v438_v57 }
  0x24   :  { %279 = vmatpush.bf16.msrb.mxu1 %v444_v38 }
  0x25   :  { %460 = vmatpush.bf16.msra.mxu2 %v437_v58 }
  0x28   :  { %280 = vmatpush.bf16.msrb.mxu1 %v443_v40 }
  0x29   :  { %360 = vmatmul.msk.bf16.gmra.mxu0 %vm84_vm0, %v68_v13 }
  0x2c   :  { %281 = vmatpush.bf16.msrb.mxu1 %v442_v43 }
  0x30   :  { %282 = vmatpush.bf16.msrb.mxu1 %v441_v54 }
  0x34   :  { %283 = vmatpush.bf16.msrb.mxu1 %v440_v55 }
  0x38   :  { %284 = vmatpush.bf16.msrb.mxu1 %v439_v56 }
  0x39   :  { %361 = vmatmul.msk.bf16.gmra.mxu0 %vm84_vm0, %v69_v16 }
  0x3c   :  { %285 = vmatpush.bf16.msrb.mxu1 %v438_v57 }
  0x40   :  { %286 = vmatpush.bf16.msrb.mxu1 %v437_v58 }
  0x86   :  { %v106_v22 = vpop.f32.mrf.mxu0 }
  0x87   :  { %v107_v24 = vadd.f32 %v461_v23, %v106_v22 }
  0x89   :  { %464 = vtanh.f32 %v107_v24  ;;  %v463_v24 = vld [vmem:[%s712_s3 + $0x2] ss:$0 sm:$0xff] }
  0x8e   :  { %v108_v25 = vpop.f32.mrf.mxu0 }
  0x8f   :  { %v109_v26 = vadd.f32 %v461_v23, %v108_v25  ;;  %v465_v27 = vpop.eup %464 }
  0x91   :  { %466 = vtanh.f32 %v109_v26 }
  0x96   :  { %v111_v28 = vpop.f32.mrf.mxu0 }
  0x97   :  { %v467_v29 = vpop.eup %466  ;;  %v112_v31 = vadd.f32 %v461_v23, %v111_v28 }
  0x98   :  { %v134_v30 = vpack.c.bf16 %v467_v29, %v465_v27 }
  0x99   :  { %468 = vtanh.f32 %v112_v31 }
  0x9a   :  { %196 = vmatmul.bf16.vlgmr.msra.gmra.mxu1 %v134_v30 }
  0x9e   :  { %v113_v32 = vpop.f32.mrf.mxu0 }
  0x9f   :  { %v114_v33 = vadd.f32 %v461_v23, %v113_v32  ;;  %v469_v34 = vpop.eup %468 }
  0xa1   :  { %470 = vtanh.f32 %v114_v33 }
  0xa6   :  { %v116_v35 = vpop.f32.mrf.mxu0 }
  0xa7   :  { %v471_v36 = vpop.eup %470  ;;  %v117_v39 = vadd.f32 %v461_v23, %v116_v35 }
  0xa8   :  { %v135_v37 = vpack.c.bf16 %v471_v36, %v469_v34 }
  0xa9   :  { %472 = vtanh.f32 %v117_v39 }
  0xaa   :  { %201 = vmatmul.bf16.vlgmr.msra.gmra.mxu3 %v135_v37 }
  0xae   :  { %v118_v41 = vpop.f32.mrf.mxu0 }
  0xaf   :  { %v119_v42 = vadd.f32 %v461_v23, %v118_v41  ;;  %v473_v44 = vpop.eup %472 }
  0xb1   :  { %474 = vtanh.f32 %v119_v42 }
  0xb6   :  { %v121_v45 = vpop.f32.mrf.mxu0 }
  0xb7   :  { %v475_v46 = vpop.eup %474  ;;  %v122_v48 = vadd.f32 %v461_v23, %v121_v45 }
  0xb8   :  { %v136_v47 = vpack.c.bf16 %v475_v46, %v473_v44 }
  0xb9   :  { %476 = vtanh.f32 %v122_v48 }
  0xba   :  { %206 = vmatmul.bf16.gmra.mxu3 %v136_v47 }
  0xbe   :  { %v123_v49 = vpop.f32.mrf.mxu0 }
  0xbf   :  { %v124_v50 = vadd.f32 %v461_v23, %v123_v49  ;;  %v477_v51 = vpop.eup %476 }
  0xc1   :  { %478 = vtanh.f32 %v124_v50 }
  0xc7   :  { %v479_v52 = vpop.eup %478 }
  0xc8   :  { %v137_v53 = vpack.c.bf16 %v479_v52, %v477_v51 }
  0xca   :  { %211 = vmatmul.bf16.gmra.mxu3 %v137_v53 }
 0x117   :  { %v197_v59 = vpop.f32.mrf.mxu1 }
 0x118   :  { %v198_v61 = vadd.f32 %v462_v60, %v197_v59 }
 0x11a   :  { %480 = vtanh.f32 %v198_v61 }
 0x11f   :  { %v199_v62 = vpop.f32.mrf.mxu1 }
 0x120   :  { %v200_v63 = vadd.f32 %v462_v60, %v199_v62  ;;  %v481_v0 = vpop.eup %480 }
 0x122   :  { %482 = vtanh.f32 %v200_v63 }
 0x128   :  { %v483_v1 = vpop.eup %482 }
 0x129   :  { %v225_v2 = vpack.c.bf16 %v483_v1, %v481_v0 }
 0x12b   :  { %287 = vmatmul.bf16.vlgmr.msrb.gmra.mxu1 %v225_v2 }
 0x12d   :  { %v202_v3 = vpop.f32.mrf.mxu3 }
 0x12e   :  { %v203_v4 = vadd.f32 %v462_v60, %v202_v3 }
 0x130   :  { %484 = vtanh.f32 %v203_v4 }
 0x135   :  { %v204_v5 = vpop.f32.mrf.mxu3 }
 0x136   :  { %v205_v6 = vadd.f32 %v462_v60, %v204_v5  ;;  %v485_v7 = vpop.eup %484 }
 0x138   :  { %486 = vtanh.f32 %v205_v6 }
 0x13d   :  { %v207_v8 = vpop.f32.mrf.mxu3 }
 0x13e   :  { %v487_v9 = vpop.eup %486  ;;  %v208_v11 = vadd.f32 %v462_v60, %v207_v8 }
 0x13f   :  { %v226_v10 = vpack.c.bf16 %v487_v9, %v485_v7 }
 0x140   :  { %488 = vtanh.f32 %v208_v11 }
 0x141   :  { %292 = vmatmul.bf16.vlgmr.msra.gmra.mxu2 %v226_v10 }
 0x145   :  { %v209_v12 = vpop.f32.mrf.mxu3 }
 0x146   :  { %v210_v13 = vadd.f32 %v462_v60, %v209_v12  ;;  %v489_v14 = vpop.eup %488 }
 0x148   :  { %490 = vtanh.f32 %v210_v13 }
 0x14d   :  { %v212_v15 = vpop.f32.mrf.mxu3 }
 0x14e   :  { %v491_v16 = vpop.eup %490  ;;  %v213_v18 = vadd.f32 %v462_v60, %v212_v15 }
 0x14f   :  { %v227_v17 = vpack.c.bf16 %v491_v16, %v489_v14 }
 0x150   :  { %492 = vtanh.f32 %v213_v18 }
 0x151   :  { %297 = vmatmul.bf16.gmra.mxu2 %v227_v17 }
 0x155   :  { %v214_v19 = vpop.f32.mrf.mxu3 }
 0x156   :  { %v215_v20 = vadd.f32 %v462_v60, %v214_v19  ;;  %v493_v21 = vpop.eup %492 }
 0x158   :  { %494 = vtanh.f32 %v215_v20 }
 0x15e   :  { %v495_v22 = vpop.eup %494 }
 0x15f   :  { %v228_v23 = vpack.c.bf16 %v495_v22, %v493_v21 }
 0x161   :  { %302 = vmatmul.bf16.gmra.mxu2 %v228_v23 }
 0x1a8   :  { %v288_v25 = vpop.f32.mrf.mxu1 }
 0x1a9   :  { %v289_v26 = vadd.f32 %v463_v24, %v288_v25 }
 0x1ab   :  { %309 = vst.msk [vmem:[%s713_s5] sm:$0xff] %vm308_vm1, %v289_v26 }
 0x1b0   :  { %v290_v27 = vpop.f32.mrf.mxu1 }
 0x1b1   :  { %v291_v28 = vadd.f32 %v463_v24, %v290_v27 }
 0x1b3   :  { %310 = vst.msk [vmem:[%s713_s5 + $0x8] sm:$0xff] %vm308_vm1, %v291_v28 }
 0x1c4   :  { %v293_v29 = vpop.f32.mrf.mxu2 }
 0x1c5   :  { %v294_v30 = vadd.f32 %v463_v24, %v293_v29 }
 0x1c7   :  { %311 = vst.msk [vmem:[%s713_s5 + $0x10] sm:$0xff] %vm308_vm1, %v294_v30 }
 0x1cc   :  { %v295_v31 = vpop.f32.mrf.mxu2 }
 0x1cd   :  { %v296_v32 = vadd.f32 %v463_v24, %v295_v31 }
 0x1cf   :  { %312 = vst.msk [vmem:[%s713_s5 + $0x18] sm:$0xff] %vm308_vm1, %v296_v32 }
 0x1d4   :  { %v298_v33 = vpop.f32.mrf.mxu2 }
 0x1d5   :  { %v299_v34 = vadd.f32 %v463_v24, %v298_v33 }
 0x1d7   :  { %313 = vst.msk [vmem:[%s713_s5 + $0x20] sm:$0xff] %vm308_vm1, %v299_v34 }
 0x1dc   :  { %v300_v35 = vpop.f32.mrf.mxu2 }
 0x1dd   :  { %v301_v36 = vadd.f32 %v463_v24, %v300_v35 }
 0x1df   :  { %314 = vst.msk [vmem:[%s713_s5 + $0x28] sm:$0xff] %vm308_vm1, %v301_v36 }
 0x1e4   :  { %v303_v37 = vpop.f32.mrf.mxu2 }
 0x1e5   :  { %v304_v38 = vadd.f32 %v463_v24, %v303_v37 }
 0x1e7   :  { %315 = vst.msk [vmem:[%s713_s5 + $0x30] sm:$0xff] %vm308_vm1, %v304_v38 }
 0x1eb   :  { %321 = sbr.rel (%p426_p0) target bundleno = 507 (0x1fb), region = 25 }
 0x1ec   :  { %v305_v39 = vpop.f32.mrf.mxu2 }
 0x1ed   :  { %v306_v40 = vadd.f32 %v463_v24, %v305_v39 }
 0x1ef   :  { %316 = vst.msk [vmem:[%s713_s5 + $0x38] sm:$0xff] %vm308_vm1, %v306_v40 }
 0x1f0   :  { %v322_v41 = vld [vmem:[%s710_s4] sm:$0xff]  ;;  %v323_v42 = vld [vmem:[%s710_s4 + $0x8] sm:$0xff]  ;;  %v324_v43 = vld [vmem:[%s710_s4 + $0x10] sm:$0xff] }
 0x1f1   :  { %v330_v44 = vadd.f32 %v322_v41, %v289_v26  ;;  %v331_v45 = vadd.f32 %v323_v42, %v291_v28  ;;  %v332_v46 = vadd.f32 %v324_v43, %v294_v30  ;;  %v325_v47 = vld [vmem:[%s710_s4 + $0x18] sm:$0xff]  ;;  %v326_v48 = vld [vmem:[%s710_s4 + $0x20] sm:$0xff]  ;;  %v327_v49 = vld [vmem:[%s710_s4 + $0x28] sm:$0xff] }
 0x1f2   :  { %v333_v50 = vadd.f32 %v325_v47, %v296_v32  ;;  %v328_v51 = vld [vmem:[%s710_s4 + $0x30] sm:$0xff]  ;;  %v334_v52 = vadd.f32 %v326_v48, %v299_v34  ;;  %v329_v53 = vld [vmem:[%s710_s4 + $0x38] sm:$0xff]  ;;  %v335_v54 = vadd.f32 %v327_v49, %v301_v36 }
 0x1f3   :  { %338 = vst.msk [vmem:[%s713_s5] sm:$0xff] %vm308_vm1, %v330_v44  ;;  %v336_v55 = vadd.f32 %v328_v51, %v304_v38  ;;  %v337_v56 = vadd.f32 %v329_v53, %v306_v40 }
 0x1f4   :  { %339 = vst.msk [vmem:[%s713_s5 + $0x8] sm:$0xff] %vm308_vm1, %v331_v45 }
 0x1f5   :  { %340 = vst.msk [vmem:[%s713_s5 + $0x10] sm:$0xff] %vm308_vm1, %v332_v46 }
 0x1f6   :  { %341 = vst.msk [vmem:[%s713_s5 + $0x18] sm:$0xff] %vm308_vm1, %v333_v50 }
 0x1f7   :  { %342 = vst.msk [vmem:[%s713_s5 + $0x20] sm:$0xff] %vm308_vm1, %v334_v52 }
 0x1f8   :  { %343 = vst.msk [vmem:[%s713_s5 + $0x28] sm:$0xff] %vm308_vm1, %v335_v54 }
 0x1f9   :  { %344 = vst.msk [vmem:[%s713_s5 + $0x30] sm:$0xff] %vm308_vm1, %v336_v55 }
 0x1fa   :  { %345 = vst.msk [vmem:[%s713_s5 + $0x38] sm:$0xff] %vm308_vm1, %v337_v56 }
 0x1fb PF:  {}

</bundles_post_ra>
